<compile_context>
chip_gen: v5e
topology: v5e:2x2
jax: 0.10.0
libtpu: 0.0.40
codegen_flags: <defaults>
</compile_context>

<pallas_src>
import functools

import jax
import jax.numpy as jnp
from jax.experimental import pallas as pl
from jax.experimental.pallas import tpu as pltpu


def _round_up(x, m):
    return ((x + m - 1) // m) * m


def _fused_mlp_kernel(n_hidden, *refs):
    # n_hidden > 0: refs = (x, w1, b1, wh, bh, wl, bl, out)
    # n_hidden == 0: refs = (x, w1, b1, wl, bl, out)
    if n_hidden > 0:
        x_ref, w1_ref, b1_ref, wh_ref, bh_ref, wl_ref, bl_ref, out_ref = refs
    else:
        x_ref, w1_ref, b1_ref, wl_ref, bl_ref, out_ref = refs

    h = jnp.dot(x_ref[...], w1_ref[...], preferred_element_type=jnp.float32)
    h = jnp.maximum(h + b1_ref[...], 0.0)
    for l in range(n_hidden):  # static trip count -> unrolled at trace time
        h = jnp.dot(h, wh_ref[l], preferred_element_type=jnp.float32)
        h = jnp.maximum(h + bh_ref[l], 0.0)
    out = jnp.dot(h, wl_ref[...], preferred_element_type=jnp.float32) + bl_ref[...]
    out_ref[...] = out.astype(out_ref.dtype)


def _block_diag(blocks):
    """blocks: [n, p, q] -> block-diagonal [n*p, n*q]."""
    n, p, q = blocks.shape
    eye = jnp.eye(n, dtype=blocks.dtype)
    return jnp.einsum("ij,iab->iajb", eye, blocks).reshape(n * p, n * q)


def pack_params(params, lane_pad=128):
    """One-time prep: pack per-ctrlpt MLP params into fused (block-diag) form.

    The last-layer columns are reordered to [all weights | all coordinates]
    and zero-padded to a multiple of `lane_pad` lanes.
    """
    w1, b1, wh, bh, wl, bl = (params["w1"], params["b1"], params["wh"],
                              params["bh"], params["wl"], params["bl"])
    n_ctrlpts, d_in, hidden = w1.shape
    n_hidden = wh.shape[1]
    d_out = wl.shape[-1]
    NH = n_ctrlpts * hidden
    n_out = n_ctrlpts * d_out
    n_pad = _round_up(n_out, lane_pad)

    # Column permutation: weight column (col 0) of every ctrlpt first, then
    # the coordinate columns of ctrlpt 0, 1, ... contiguously.
    perm = ([i * d_out for i in range(n_ctrlpts)] +
            [i * d_out + j for i in range(n_ctrlpts) for j in range(1, d_out)])
    perm = jnp.asarray(perm, dtype=jnp.int32)

    wl_bd = _block_diag(wl)                         # [NH, n_out]
    bl_flat = bl.reshape(1, n_out)                  # [1, n_out]
    wl_r = jnp.take(wl_bd, perm, axis=1)
    bl_r = jnp.take(bl_flat, perm, axis=1)
    wl_p = jnp.zeros((NH, n_pad), wl.dtype).at[:, :n_out].set(wl_r)
    bl_p = jnp.zeros((1, n_pad), bl.dtype).at[:, :n_out].set(bl_r)

    packed = {
        "w1": jnp.transpose(w1, (1, 0, 2)).reshape(d_in, NH),   # [d_in, NH]
        "b1": b1.reshape(1, NH),                                # [1, NH]
        "wl": wl_p,                                             # [NH, n_pad]
        "bl": bl_p,                                             # [1, n_pad]
    }
    if n_hidden > 0:
        packed["wh"] = jax.vmap(_block_diag)(jnp.transpose(wh, (1, 0, 2, 3)))
        packed["bh"] = jnp.transpose(bh, (1, 0, 2, 3)).reshape(n_hidden, 1, NH)
    else:
        packed["wh"] = None
        packed["bh"] = None
    return packed


def predict_control_points(x, packed, *, n_ctrlpts, d_out, block_b=256):
    """x: [B, D_in] f32; packed: output of pack_params.

    Returns (ctrlpts [B, n_ctrlpts, D_out-1], weights [B, n_ctrlpts]).
    """
    B, d_in = x.shape
    NH = packed["w1"].shape[1]
    n_pad = packed["wl"].shape[1]
    n_out = n_ctrlpts * d_out
    n_hidden = 0 if packed["wh"] is None else packed["wh"].shape[0]

    # Batch tile: multiple of 8 (sublane), up to block_b; pad B to a multiple.
    TB = min(block_b, _round_up(B, 8))
    B_pad = _round_up(B, TB)
    if B_pad != B:
        x = jnp.pad(x, ((0, B_pad - B), (0, 0)))
    grid = (B_pad // TB,)

    inputs = [x, packed["w1"], packed["b1"]]
    in_specs = [
        pl.BlockSpec((TB, d_in), lambda i: (i, 0)),            # x: blocked on batch
        pl.BlockSpec((d_in, NH), lambda i: (0, 0)),            # resident weights
        pl.BlockSpec((1, NH), lambda i: (0, 0)),
    ]
    if n_hidden > 0:
        inputs += [packed["wh"], packed["bh"]]
        in_specs += [
            pl.BlockSpec((n_hidden, NH, NH), lambda i: (0, 0, 0)),
            pl.BlockSpec((n_hidden, 1, NH), lambda i: (0, 0, 0)),
        ]
    inputs += [packed["wl"], packed["bl"]]
    in_specs += [
        pl.BlockSpec((NH, n_pad), lambda i: (0, 0)),
        pl.BlockSpec((1, n_pad), lambda i: (0, 0)),
    ]
    out_spec = pl.BlockSpec((TB, n_pad), lambda i: (i, 0))     # lane-dense output

    # Cost of what actually executes (padded matmuls over the padded batch).
    flops = 2 * B_pad * (d_in * NH + n_hidden * NH * NH + NH * n_pad)
    weight_bytes = 4 * sum(int(a.size) for a in inputs[1:])
    bytes_accessed = 4 * (B_pad * d_in + B_pad * n_pad) + weight_bytes

    # Explicit VMEM budget: resident weights + double-buffered x/out tiles.
    io_block_bytes = 4 * (TB * d_in + TB * n_pad)
    vmem_limit = int(min(max(2 * (weight_bytes + io_block_bytes) + (4 << 20),
                             16 << 20), 48 << 20))

    out = pl.pallas_call(
        functools.partial(_fused_mlp_kernel, n_hidden),
        out_shape=jax.ShapeDtypeStruct((B_pad, n_pad), jnp.float32),
        grid=grid,
        in_specs=in_specs,
        out_specs=out_spec,
        compiler_params=pltpu.CompilerParams(
            dimension_semantics=("parallel",),
            vmem_limit_bytes=vmem_limit),
        cost_estimate=pl.CostEstimate(
            flops=flops, transcendentals=0, bytes_accessed=bytes_accessed),
    )(*inputs)

    out = out[:B]
    weights = out[:, :n_ctrlpts]                                   # contiguous
    ctrlpts = out[:, n_ctrlpts:n_out].reshape(B, n_ctrlpts, d_out - 1)
    return ctrlpts, weights


def _init_params(key, n_ctrlpts, n_layers, d_in, hidden, d_out):
    """Deterministic synthetic per-ctrlpt parameters (stacked, unpacked form)."""
    n_hidden = max(n_layers - 2, 0)
    keys = jax.random.split(key, 6)
    scale = 0.05
    return {
        "w1": scale * jax.random.normal(keys[0], (n_ctrlpts, d_in, hidden), jnp.float32),
        "b1": scale * jax.random.normal(keys[1], (n_ctrlpts, 1, hidden), jnp.float32),
        "wh": scale * jax.random.normal(keys[2], (n_ctrlpts, n_hidden, hidden, hidden), jnp.float32),
        "bh": scale * jax.random.normal(keys[3], (n_ctrlpts, n_hidden, 1, hidden), jnp.float32),
        "wl": scale * jax.random.normal(keys[4], (n_ctrlpts, hidden, d_out), jnp.float32),
        "bl": scale * jax.random.normal(keys[5], (n_ctrlpts, 1, d_out), jnp.float32),
    }


def _reference(x, params):
    """Pure-JAX reference reproducing the PyTorch forward semantics."""
    hp = jax.lax.Precision.HIGHEST
    n_ctrlpts = params["w1"].shape[0]
    n_hidden = params["wh"].shape[1]
    outs = []
    for i in range(n_ctrlpts):
        h = jnp.dot(x, params["w1"][i], precision=hp) + params["b1"][i]
        h = jnp.maximum(h, 0.0)
        for l in range(n_hidden):
            h = jnp.dot(h, params["wh"][i, l], precision=hp) + params["bh"][i, l]
            h = jnp.maximum(h, 0.0)
        o = jnp.dot(h, params["wl"][i], precision=hp) + params["bl"][i]
        outs.append(o)
    out = jnp.stack(outs, axis=0)                       # [n_ctrlpts, B, D_out]
    ctrlpts = jnp.transpose(out[:, :, 1:], (1, 0, 2))   # [B, n_ctrlpts, D_out-1]
    weights = jnp.transpose(out[:, :, 0], (1, 0))       # [B, n_ctrlpts]
    return ctrlpts, weights


if __name__ == "__main__":
    # size = (input_size, hidden_size, output_size); output col 0 is the weight,
    # cols 1: are the control-point coordinates.
    B = 8
    d_in, hidden, d_out = 32, 64, 4
    n_layers = 3
    n_ctrlpts = 4

    key = jax.random.PRNGKey(0)
    kx, kp = jax.random.split(key)
    x = jax.random.normal(kx, (B, d_in), jnp.float32)
    params = _init_params(kp, n_ctrlpts, n_layers, d_in, hidden, d_out)

    packed = pack_params(params)  # one-time JAX prep (concat / block-diag / pad)
    fwd = jax.jit(functools.partial(predict_control_points,
                                    n_ctrlpts=n_ctrlpts, d_out=d_out))
    ctrlpts, weights = fwd(x, packed)
    jax.block_until_ready((ctrlpts, weights))

    ref_ctrlpts, ref_weights = _reference(x, params)
    assert ctrlpts.shape == (B, n_ctrlpts, d_out - 1)
    assert weights.shape == (B, n_ctrlpts)
    assert jnp.allclose(ctrlpts, ref_ctrlpts, atol=1e-5, rtol=1e-5)
    assert jnp.allclose(weights, ref_weights, atol=1e-5, rtol=1e-5)

    print("KERNEL_OK")
</pallas_src>

<mosaic_0001>
module attributes {stable_mosaic.version = 11 : i64} {
  func.func @_fused_mlp_kernel(%arg0: i32, %arg1: memref<8x32xf32, #tpu.memory_space<vmem>>, %arg2: memref<32x256xf32, #tpu.memory_space<vmem>>, %arg3: memref<1x256xf32, #tpu.memory_space<vmem>>, %arg4: memref<1x256x256xf32, #tpu.memory_space<vmem>>, %arg5: memref<1x1x256xf32, #tpu.memory_space<vmem>>, %arg6: memref<256x128xf32, #tpu.memory_space<vmem>>, %arg7: memref<1x128xf32, #tpu.memory_space<vmem>>, %arg8: memref<8x128xf32, #tpu.memory_space<vmem>>) attributes {dimension_semantics = [#tpu.dimension_semantics<parallel>], iteration_bounds = array<i64: 1>, scalar_prefetch = 0 : i64, scratch_operands = 0 : i64, tpu.core_type = #tpu.core_type<tc>, window_params = [{transform_indices = @transform_0, window_bounds = array<i64: 8, 32>}, {pipeline_mode = #tpu.pipeline_mode<synchronous>, transform_indices = @transform_1, window_bounds = array<i64: 32, 256>}, {pipeline_mode = #tpu.pipeline_mode<synchronous>, transform_indices = @transform_2, window_bounds = array<i64: 1, 256>}, {pipeline_mode = #tpu.pipeline_mode<synchronous>, transform_indices = @transform_3, window_bounds = array<i64: 1, 256, 256>}, {pipeline_mode = #tpu.pipeline_mode<synchronous>, transform_indices = @transform_4, window_bounds = array<i64: 1, 1, 256>}, {pipeline_mode = #tpu.pipeline_mode<synchronous>, transform_indices = @transform_5, window_bounds = array<i64: 256, 128>}, {pipeline_mode = #tpu.pipeline_mode<synchronous>, transform_indices = @transform_6, window_bounds = array<i64: 1, 128>}, {transform_indices = @transform_7, window_bounds = array<i64: 8, 128>}]} {
    %c0 = arith.constant 0 : index
    %c0_0 = arith.constant 0 : index
    %0 = vector.load %arg1[%c0, %c0_0] : memref<8x32xf32, #tpu.memory_space<vmem>>, vector<8x32xf32>
    %c0_1 = arith.constant 0 : index
    %c0_2 = arith.constant 0 : index
    %1 = vector.load %arg2[%c0_1, %c0_2] : memref<32x256xf32, #tpu.memory_space<vmem>>, vector<32x256xf32>
    %cst = arith.constant dense<0.000000e+00> : vector<8x256xf32>
    %2 = tpu.matmul %0, %1, %cst {dimension_numbers = #tpu.dot_dimension_numbers<[1], [0], [0], [1], [0, 0, 1, 1], [], []>} : vector<8x32xf32>, vector<32x256xf32>, vector<8x256xf32> -> vector<8x256xf32>
    %c0_3 = arith.constant 0 : index
    %c0_4 = arith.constant 0 : index
    %3 = vector.load %arg3[%c0_3, %c0_4] : memref<1x256xf32, #tpu.memory_space<vmem>>, vector<1x256xf32>
    %4 = vector.broadcast %3 : vector<1x256xf32> to vector<8x256xf32>
    %5 = arith.addf %2, %4 : vector<8x256xf32>
    %cst_5 = arith.constant 0.000000e+00 : f32
    %6 = vector.broadcast %cst_5 : f32 to vector<8x256xf32>
    %7 = arith.maximumf %5, %6 : vector<8x256xf32>
    %c0_6 = arith.constant 0 : index
    %c0_7 = arith.constant 0 : index
    %c0_8 = arith.constant 0 : index
    %8 = vector.load %arg4[%c0_6, %c0_7, %c0_8] : memref<1x256x256xf32, #tpu.memory_space<vmem>>, vector<1x256x256xf32>
    %9 = vector.shape_cast %8 : vector<1x256x256xf32> to vector<256x256xf32>
    %cst_9 = arith.constant dense<0.000000e+00> : vector<8x256xf32>
    %10 = tpu.matmul %7, %9, %cst_9 {dimension_numbers = #tpu.dot_dimension_numbers<[1], [0], [0], [1], [0, 0, 1, 1], [], []>} : vector<8x256xf32>, vector<256x256xf32>, vector<8x256xf32> -> vector<8x256xf32>
    %c0_10 = arith.constant 0 : index
    %c0_11 = arith.constant 0 : index
    %c0_12 = arith.constant 0 : index
    %11 = vector.load %arg5[%c0_10, %c0_11, %c0_12] : memref<1x1x256xf32, #tpu.memory_space<vmem>>, vector<1x1x256xf32>
    %12 = vector.shape_cast %11 : vector<1x1x256xf32> to vector<1x256xf32>
    %13 = vector.broadcast %12 : vector<1x256xf32> to vector<8x256xf32>
    %14 = arith.addf %10, %13 : vector<8x256xf32>
    %cst_13 = arith.constant 0.000000e+00 : f32
    %15 = vector.broadcast %cst_13 : f32 to vector<8x256xf32>
    %16 = arith.maximumf %14, %15 : vector<8x256xf32>
    %c0_14 = arith.constant 0 : index
    %c0_15 = arith.constant 0 : index
    %17 = vector.load %arg6[%c0_14, %c0_15] : memref<256x128xf32, #tpu.memory_space<vmem>>, vector<256x128xf32>
    %cst_16 = arith.constant dense<0.000000e+00> : vector<8x128xf32>
    %18 = tpu.matmul %16, %17, %cst_16 {dimension_numbers = #tpu.dot_dimension_numbers<[1], [0], [0], [1], [0, 0, 1, 1], [], []>} : vector<8x256xf32>, vector<256x128xf32>, vector<8x128xf32> -> vector<8x128xf32>
    %c0_17 = arith.constant 0 : index
    %c0_18 = arith.constant 0 : index
    %19 = vector.load %arg7[%c0_17, %c0_18] : memref<1x128xf32, #tpu.memory_space<vmem>>, vector<1x128xf32>
    %20 = vector.broadcast %19 : vector<1x128xf32> to vector<8x128xf32>
    %21 = arith.addf %18, %20 : vector<8x128xf32>
    %c0_19 = arith.constant 0 : index
    %c0_20 = arith.constant 0 : index
    %22 = vector.load %arg8[%c0_19, %c0_20] : memref<8x128xf32, #tpu.memory_space<vmem>>, vector<8x128xf32>
    tpu.vector_store %arg8[%c0_19, %c0_20], %21 {strides = array<i32>} : memref<8x128xf32, #tpu.memory_space<vmem>>, vector<8x128xf32>,
    return
  }
  func.func @transform_0(%arg0: i32) -> (i32, i32) {
    %c0_i32 = arith.constant 0 : i32
    %c0_i32_0 = arith.constant 0 : i32
    return %arg0, %c0_i32 : i32, i32
  }
  func.func @transform_1(%arg0: i32) -> (i32, i32) {
    %c0_i32 = arith.constant 0 : i32
    %c0_i32_0 = arith.constant 0 : i32
    %c0_i32_1 = arith.constant 0 : i32
    return %c0_i32, %c0_i32_0 : i32, i32
  }
  func.func @transform_2(%arg0: i32) -> (i32, i32) {
    %c0_i32 = arith.constant 0 : i32
    %c0_i32_0 = arith.constant 0 : i32
    %c0_i32_1 = arith.constant 0 : i32
    return %c0_i32, %c0_i32_0 : i32, i32
  }
  func.func @transform_3(%arg0: i32) -> (i32, i32, i32) {
    %c0_i32 = arith.constant 0 : i32
    %c0_i32_0 = arith.constant 0 : i32
    %c0_i32_1 = arith.constant 0 : i32
    %c0_i32_2 = arith.constant 0 : i32
    return %c0_i32, %c0_i32_0, %c0_i32_1 : i32, i32, i32
  }
  func.func @transform_4(%arg0: i32) -> (i32, i32, i32) {
    %c0_i32 = arith.constant 0 : i32
    %c0_i32_0 = arith.constant 0 : i32
    %c0_i32_1 = arith.constant 0 : i32
    %c0_i32_2 = arith.constant 0 : i32
    return %c0_i32, %c0_i32_0, %c0_i32_1 : i32, i32, i32
  }
  func.func @transform_5(%arg0: i32) -> (i32, i32) {
    %c0_i32 = arith.constant 0 : i32
    %c0_i32_0 = arith.constant 0 : i32
    %c0_i32_1 = arith.constant 0 : i32
    return %c0_i32, %c0_i32_0 : i32, i32
  }
  func.func @transform_6(%arg0: i32) -> (i32, i32) {
    %c0_i32 = arith.constant 0 : i32
    %c0_i32_0 = arith.constant 0 : i32
    %c0_i32_1 = arith.constant 0 : i32
    return %c0_i32, %c0_i32_0 : i32, i32
  }
  func.func @transform_7(%arg0: i32) -> (i32, i32) {
    %c0_i32 = arith.constant 0 : i32
    %c0_i32_0 = arith.constant 0 : i32
    return %arg0, %c0_i32 : i32, i32
  }
}

</mosaic_0001>

<bundles_post_ra>
// kernel: predict_control_points.1
= control target key start
LH: loop header
LB: loop body
LE: loop exit
PB: predicated region body
PF: predicated region fallthrough
CT: control target
= control target key end

     0   :  { %12 = vsyncpa [#allocation3], 0  ;;  %s651_s0 = inlined_call_operand.hbm [shape: f32[8,32], index: 0, kind: input, shape index: {}]   ;;  %s652_s1 = inlined_call_operand.hbm [shape: f32[32,256], index: 1, kind: input, shape index: {}]   ;;  %s653_s2 = inlined_call_operand.hbm [shape: f32[1,256], index: 2, kind: input, shape index: {}]   ;;  %s654_s3 = inlined_call_operand.hbm [shape: f32[1,256,256], index: 3, kind: input, shape index: {}]   ;;  %s655_s4 = inlined_call_operand.hbm [shape: f32[1,1,256], index: 4, kind: input, shape index: {}]   ;;  %s656_s5 = inlined_call_operand.hbm [shape: f32[256,128], index: 5, kind: input, shape index: {}]   ;;  %s657_s6 = inlined_call_operand.vmem [shape: f32[1,128], index: 6, kind: input, shape index: {}]   ;;  %s658_s7 = inlined_call_operand.vmem [shape: f32[8,128], index: 7, kind: output, shape index: {}]  }
   0x1   :  { %13 = vsyncpa [#allocation5], 0 }
   0x2   :  { %14 = vsyncpa [#allocation8], 0  ;;  %s31_s26 = sshll.u32 %s652_s1, 4  ;;  %s32_s26 = int_to_ptr.hbm [resolvable:$true] %s31_s26 }
   0x3   :  { %15 = vsyncpa [#allocation11], 0  ;;  %s577_s27 = smov [#allocation4]   ;;  %s55_s8 = sshll.u32 %s654_s3, 4  ;;  %s56_s8 = int_to_ptr.hbm [resolvable:$true] %s55_s8 }
   0x4   :  { %s33_s28 = sshll.u32 %s577_s27, 4  ;;  %s578_s9 = smov 256   ;;  %s34_s28 = int_to_ptr.vmem [resolvable:$true] %s33_s28 }
   0x5   :  { %s579_s10 = smov 16   ;;  %s580_s11 = smov [#allocation7]  }
   0x6   :  { %39 = dma.hbm_to_vmem [thread:$0]  %s32_s26, 1024, %s34_s28, [#allocation5], %s578_s9, %s578_s9, %s579_s10  }
   0x7   :  { %s57_s12 = sshll.u32 %s580_s11, 4  ;;  %s21_s15 = sshll.u32 %s651_s0, 4  ;;  %s58_s12 = int_to_ptr.vmem [resolvable:$true] %s57_s12  ;;  %s22_s15 = int_to_ptr.hbm [resolvable:$true] %s21_s15 }
   0x8   :  { %63 = dma.hbm_to_vmem [thread:$0]  %s56_s8, 8192, %s58_s12, [#allocation8], %s578_s9, %s578_s9, %s579_s10  }
   0x9   :  { %s45_s17 = sshll.u32 %s653_s2, 4  ;;  %s581_s18 = smov [#allocation2]   ;;  %s46_s17 = int_to_ptr.hbm [resolvable:$true] %s45_s17 }
   0xa   :  { %s23_s19 = sshll.u32 %s581_s18, 4  ;;  %s582_s3 = smov [#allocation6]   ;;  %s24_s19 = int_to_ptr.vmem [resolvable:$true] %s23_s19 }
   0xb   :  { %26 = dma.hbm_to_vmem [thread:$0]  %s22_s15, 128, %s24_s19, [#allocation3]  }
   0xc   :  { %s47_s20 = sshll.u32 %s582_s3, 4  ;;  %s69_s23 = sshll.u32 %s655_s4, 4  ;;  %s48_s20 = int_to_ptr.vmem [resolvable:$true] %s47_s20  ;;  %s70_s23 = int_to_ptr.hbm [resolvable:$true] %s69_s23 }
   0xd   :  { %50 = dma.hbm_to_vmem [thread:$0]  %s46_s17, 32, %s48_s20, [#allocation5]  }
   0xe   :  { %s79_s25 = sshll.u32 %s656_s5, 4  ;;  %s583_s26 = smov [#allocation9]   ;;  %s80_s25 = int_to_ptr.hbm [resolvable:$true] %s79_s25 }
   0xf   :  { %s71_s2 = sshll.u32 %s583_s26, 4  ;;  %s584_s27 = smov [#allocation10]   ;;  %s72_s2 = int_to_ptr.vmem [resolvable:$true] %s71_s2 }
  0x10   :  { %74 = dma.hbm_to_vmem [thread:$0]  %s70_s23, 32, %s72_s2, [#allocation8]  }
  0x11   :  { %s81_s28 = sshll.u32 %s584_s27, 4  ;;  %s585_s29 = smov 128   ;;  %s82_s28 = int_to_ptr.vmem [resolvable:$true] %s81_s28 }
  0x12   :  { %s586_s30 = smov 8  }
  0x13   :  { %87 = dma.hbm_to_vmem [thread:$0]  %s80_s25, 4096, %s82_s28, [#allocation11], %s585_s29, %s585_s29, %s586_s30  }
  0x14   :  { %569 = dma.done.wait [#allocation3], 128  }
  0x15   :  { %570 = vsyncadd [#allocation3], 4294967168 }
  0x16   :  { %571 = dma.done.wait [#allocation5], 1056  }
  0x17   :  { %572 = vsyncadd [#allocation5], 4294966240 }
  0x18   :  { %573 = dma.done.wait [#allocation8], 8224  }
  0x19   :  { %574 = vsyncadd [#allocation8], 4294959072 }
  0x1a   :  { %575 = dma.done.wait [#allocation11], 4096  }
  0x1b   :  { %576 = vsyncadd [#allocation11], 4294963200  ;;  %v121_v0 = vld [vmem:[#allocation4 + $0x30] sm:$0xff]  ;;  %v119_v1 = vld [vmem:[#allocation4 + $0x20] sm:$0xff]  ;;  %vm129_vm0 = vcmask 261120  }
  0x1c   :  { %v122_v2 = vld [vmem:[#allocation4 + $0x38] sm:$0xff]  ;;  %145 = vmatpush.msra.mxu0 %v121_v0  ;;  %v120_v3 = vld [vmem:[#allocation4 + $0x28] sm:$0xff]  ;;  %v117_v4 = vld [vmem:[#allocation4 + $0x10] sm:$0xff] }
  0x1d   :  { %165 = vmatpush.msra.mxu1 %v122_v2  ;;  %v118_v5 = vld [vmem:[#allocation4 + $0x18] sm:$0xff]  ;;  %v203_v7 = vld [vmem:[#allocation7 + $0xe0] sm:$0xff]  ;;  %v204_v16 = vld [vmem:[#allocation7 + $0xe8] sm:$0xff] }
  0x1e   :  { %146 = vmatpush.msra.mxu0 %v119_v1  ;;  %v205_v6 = vld [vmem:[#allocation7 + $0xf0] sm:$0xff]  ;;  %v115_v8 = vld [vmem:[#allocation4] sm:$0xff]  ;;  %v116_v9 = vld [vmem:[#allocation4 + $0x8] sm:$0xff] }
  0x1f   :  { %166 = vmatpush.msra.mxu1 %v120_v3  ;;  %245 = vmatpush.msra.mxu2 %v205_v6  ;;  %v237_v10 = vld [vmem:[#allocation7 + $0x1f0] sm:$0xff]  ;;  %v206_v12 = vld [vmem:[#allocation7 + $0xf8] sm:$0xff]  ;;  %v235_v15 = vld [vmem:[#allocation7 + $0x1e0] sm:$0xff] }
  0x20   :  { %147 = vmatpush.msra.mxu0 %v117_v4  ;;  %v114_v11 = vld [vmem:[#allocation2] sm:$0xff]  ;;  %265 = vmatpush.msra.mxu3 %v237_v10  ;;  %v236_v17 = vld [vmem:[#allocation7 + $0x1e8] sm:$0xff]  ;;  %v199_v18 = vld [vmem:[#allocation7 + $0xc0] sm:$0xff] }
  0x21   :  { %167 = vmatpush.msra.mxu1 %v118_v5  ;;  %246 = vmatpush.msra.mxu2 %v203_v7  ;;  %v238_v13 = vld [vmem:[#allocation7 + $0x1f8] sm:$0xff]  ;;  %v201_v14 = vld [vmem:[#allocation7 + $0xd0] sm:$0xff]  ;;  %v231_v23 = vld [vmem:[#allocation7 + $0x1c0] sm:$0xff] }
  0x22   :  { %148 = vmatpush.msra.mxu0 %v115_v8  ;;  %v233_v19 = vld [vmem:[#allocation7 + $0x1d0] sm:$0xff]  ;;  %266 = vmatpush.msra.mxu3 %v235_v15  ;;  %v202_v20 = vld [vmem:[#allocation7 + $0xd8] sm:$0xff]  ;;  %v200_v24 = vld [vmem:[#allocation7 + $0xc8] sm:$0xff] }
  0x23   :  { %168 = vmatpush.msra.mxu1 %v116_v9  ;;  %412 = vmatmul.msk.f32.vlgmr.msra.gmra.mxu0 %vm129_vm0, %v114_v11  ;;  %v234_v21 = vld [vmem:[#allocation7 + $0x1d8] sm:$0xff]  ;;  %v197_v22 = vld [vmem:[#allocation7 + $0xb0] sm:$0xff]  ;;  %v232_v25 = vld [vmem:[#allocation7 + $0x1c8] sm:$0xff] }
  0x24   :  { %413 = vmatmul.msk.f32.vlgmr.msra.gmra.mxu1 %vm129_vm0, %v114_v11  ;;  %285 = vmatpush.msrb.mxu0 %v206_v12  ;;  %v195_v26 = vld [vmem:[#allocation7 + $0xa0] sm:$0xff]  ;;  %v229_v27 = vld [vmem:[#allocation7 + $0x1b0] sm:$0xff]  ;;  %v198_v28 = vld [vmem:[#allocation7 + $0xb8] sm:$0xff] }
  0x25   :  { %305 = vmatpush.msrb.mxu1 %v238_v13  ;;  %247 = vmatpush.msra.mxu2 %v201_v14  ;;  %v230_v29 = vld [vmem:[#allocation7 + $0x1b8] sm:$0xff]  ;;  %v193_v30 = vld [vmem:[#allocation7 + $0x90] sm:$0xff]  ;;  %v227_v31 = vld [vmem:[#allocation7 + $0x1a0] sm:$0xff] }
  0x26   :  { %286 = vmatpush.msrb.mxu0 %v204_v16  ;;  %267 = vmatpush.msra.mxu3 %v233_v19  ;;  %v196_v32 = vld [vmem:[#allocation7 + $0xa8] sm:$0xff]  ;;  %v191_v34 = vld [vmem:[#allocation7 + $0x80] sm:$0xff]  ;;  %v225_v35 = vld [vmem:[#allocation7 + $0x190] sm:$0xff] }
  0x27   :  { %306 = vmatpush.msrb.mxu1 %v236_v17  ;;  %248 = vmatpush.msra.mxu2 %v199_v18  ;;  %v228_v33 = vld [vmem:[#allocation7 + $0x1a8] sm:$0xff]  ;;  %v194_v36 = vld [vmem:[#allocation7 + $0x98] sm:$0xff]  ;;  %v189_v38 = vld [vmem:[#allocation7 + $0x70] sm:$0xff] }
  0x28   :  { %287 = vmatpush.msrb.mxu0 %v202_v20  ;;  %268 = vmatpush.msra.mxu3 %v231_v23  ;;  %v226_v37 = vld [vmem:[#allocation7 + $0x198] sm:$0xff]  ;;  %v223_v39 = vld [vmem:[#allocation7 + $0x180] sm:$0xff]  ;;  %v192_v40 = vld [vmem:[#allocation7 + $0x88] sm:$0xff] }
  0x29   :  { %307 = vmatpush.msrb.mxu1 %v234_v21  ;;  %249 = vmatpush.msra.mxu2 %v197_v22  ;;  %v224_v41 = vld [vmem:[#allocation7 + $0x188] sm:$0xff]  ;;  %v187_v42 = vld [vmem:[#allocation7 + $0x60] sm:$0xff]  ;;  %v221_v43 = vld [vmem:[#allocation7 + $0x170] sm:$0xff] }
  0x2a   :  { %288 = vmatpush.msrb.mxu0 %v200_v24  ;;  %269 = vmatpush.msra.mxu3 %v229_v27  ;;  %v190_v44 = vld [vmem:[#allocation7 + $0x78] sm:$0xff]  ;;  %v185_v46 = vld [vmem:[#allocation7 + $0x50] sm:$0xff]  ;;  %v219_v47 = vld [vmem:[#allocation7 + $0x160] sm:$0xff] }
  0x2b   :  { %308 = vmatpush.msrb.mxu1 %v232_v25  ;;  %250 = vmatpush.msra.mxu2 %v195_v26  ;;  %v222_v45 = vld [vmem:[#allocation7 + $0x178] sm:$0xff]  ;;  %v188_v48 = vld [vmem:[#allocation7 + $0x68] sm:$0xff]  ;;  %v183_v50 = vld [vmem:[#allocation7 + $0x40] sm:$0xff] }
  0x2c   :  { %289 = vmatpush.msrb.mxu0 %v198_v28  ;;  %270 = vmatpush.msra.mxu3 %v227_v31  ;;  %v220_v49 = vld [vmem:[#allocation7 + $0x168] sm:$0xff]  ;;  %v217_v51 = vld [vmem:[#allocation7 + $0x150] sm:$0xff]  ;;  %v186_v52 = vld [vmem:[#allocation7 + $0x58] sm:$0xff] }
  0x2d   :  { %309 = vmatpush.msrb.mxu1 %v230_v29  ;;  %251 = vmatpush.msra.mxu2 %v193_v30  ;;  %v218_v53 = vld [vmem:[#allocation7 + $0x158] sm:$0xff]  ;;  %v181_v54 = vld [vmem:[#allocation7 + $0x30] sm:$0xff]  ;;  %v215_v55 = vld [vmem:[#allocation7 + $0x140] sm:$0xff] }
  0x2e   :  { %290 = vmatpush.msrb.mxu0 %v196_v32  ;;  %271 = vmatpush.msra.mxu3 %v225_v35  ;;  %v184_v56 = vld [vmem:[#allocation7 + $0x48] sm:$0xff]  ;;  %v182_v58 = vld [vmem:[#allocation7 + $0x38] sm:$0xff]  ;;  %v179_v59 = vld [vmem:[#allocation7 + $0x20] sm:$0xff] }
  0x2f   :  { %310 = vmatpush.msrb.mxu1 %v228_v33  ;;  %252 = vmatpush.msra.mxu2 %v191_v34  ;;  %v216_v57 = vld [vmem:[#allocation7 + $0x148] sm:$0xff]  ;;  %v213_v60 = vld [vmem:[#allocation7 + $0x130] sm:$0xff]  ;;  %v214_v62 = vld [vmem:[#allocation7 + $0x138] sm:$0xff] }
  0x30   :  { %291 = vmatpush.msrb.mxu0 %v194_v36  ;;  %272 = vmatpush.msra.mxu3 %v223_v39  ;;  %v180_v61 = vld [vmem:[#allocation7 + $0x28] sm:$0xff]  ;;  %v177_v63 = vld [vmem:[#allocation7 + $0x10] sm:$0xff]  ;;  %v211_v0 = vld [vmem:[#allocation7 + $0x120] sm:$0xff] }
  0x31   :  { %311 = vmatpush.msrb.mxu1 %v226_v37  ;;  %253 = vmatpush.msra.mxu2 %v189_v38  ;;  %v178_v1 = vld [vmem:[#allocation7 + $0x18] sm:$0xff]  ;;  %v212_v2 = vld [vmem:[#allocation7 + $0x128] sm:$0xff]  ;;  %v175_v3 = vld [vmem:[#allocation7] sm:$0xff] }
  0x32   :  { %292 = vmatpush.msrb.mxu0 %v192_v40  ;;  %273 = vmatpush.msra.mxu3 %v221_v43  ;;  %v209_v4 = vld [vmem:[#allocation7 + $0x110] sm:$0xff]  ;;  %v176_v5 = vld [vmem:[#allocation7 + $0x8] sm:$0xff]  ;;  %v210_v6 = vld [vmem:[#allocation7 + $0x118] sm:$0xff] }
  0x33   :  { %312 = vmatpush.msrb.mxu1 %v224_v41  ;;  %254 = vmatpush.msra.mxu2 %v187_v42  ;;  %v207_v7 = vld [vmem:[#allocation7 + $0x100] sm:$0xff]  ;;  %v208_v8 = vld [vmem:[#allocation7 + $0x108] sm:$0xff]  ;;  %v357_v10 = vld [vmem:[#allocation10 + $0xf0] sm:$0xff] }
  0x34   :  { %293 = vmatpush.msrb.mxu0 %v190_v44  ;;  %274 = vmatpush.msra.mxu3 %v219_v47  ;;  %v358_v9 = vld [vmem:[#allocation10 + $0xf8] sm:$0xff]  ;;  %v341_v12 = vld [vmem:[#allocation10 + $0x70] sm:$0xff]  ;;  %v356_v13 = vld [vmem:[#allocation10 + $0xe8] sm:$0xff] }
  0x35   :  { %313 = vmatpush.msrb.mxu1 %v222_v45  ;;  %255 = vmatpush.msra.mxu2 %v185_v46  ;;  %v342_v11 = vld [vmem:[#allocation10 + $0x78] sm:$0xff]  ;;  %v340_v14 = vld [vmem:[#allocation10 + $0x68] sm:$0xff]  ;;  %v355_v15 = vld [vmem:[#allocation10 + $0xe0] sm:$0xff] }
  0x36   :  { %294 = vmatpush.msrb.mxu0 %v188_v48  ;;  %275 = vmatpush.msra.mxu3 %v217_v51  ;;  %v339_v16 = vld [vmem:[#allocation10 + $0x60] sm:$0xff]  ;;  %v354_v17 = vld [vmem:[#allocation10 + $0xd8] sm:$0xff]  ;;  %v353_v19 = vld [vmem:[#allocation10 + $0xd0] sm:$0xff] }
  0x37   :  { %314 = vmatpush.msrb.mxu1 %v220_v49  ;;  %256 = vmatpush.msra.mxu2 %v183_v50  ;;  %v338_v18 = vld [vmem:[#allocation10 + $0x58] sm:$0xff]  ;;  %v337_v20 = vld [vmem:[#allocation10 + $0x50] sm:$0xff]  ;;  %v352_v21 = vld [vmem:[#allocation10 + $0xc8] sm:$0xff] }
  0x38   :  { %295 = vmatpush.msrb.mxu0 %v186_v52  ;;  %276 = vmatpush.msra.mxu3 %v215_v55  ;;  %v336_v22 = vld [vmem:[#allocation10 + $0x48] sm:$0xff]  ;;  %v351_v23 = vld [vmem:[#allocation10 + $0xc0] sm:$0xff]  ;;  %v350_v25 = vld [vmem:[#allocation10 + $0xb8] sm:$0xff] }
  0x39   :  { %315 = vmatpush.msrb.mxu1 %v218_v53  ;;  %257 = vmatpush.msra.mxu2 %v181_v54  ;;  %v335_v24 = vld [vmem:[#allocation10 + $0x40] sm:$0xff]  ;;  %v334_v26 = vld [vmem:[#allocation10 + $0x38] sm:$0xff]  ;;  %v349_v27 = vld [vmem:[#allocation10 + $0xb0] sm:$0xff] }
  0x3a   :  { %296 = vmatpush.msrb.mxu0 %v184_v56  ;;  %277 = vmatpush.msra.mxu3 %v213_v60  ;;  %v348_v28 = vld [vmem:[#allocation10 + $0xa8] sm:$0xff]  ;;  %v123_v29 = vld [vmem:[#allocation6] sm:$0x3]  ;;  %v347_v30 = vld [vmem:[#allocation10 + $0xa0] sm:$0xff] }
  0x3b   :  { %316 = vmatpush.msrb.mxu1 %v216_v57  ;;  %258 = vmatpush.msra.mxu2 %v179_v59  ;;  %v125_v31 = vperm.slane %v123_v29, 0  ;;  %v126_v32 = vperm.slane %v123_v29, 1  ;;  %v333_v39 = vld [vmem:[#allocation10 + $0x30] sm:$0xff]  ;;  %v346_v40 = vld [vmem:[#allocation10 + $0x98] sm:$0xff]  ;;  %v332_v41 = vld [vmem:[#allocation10 + $0x28] sm:$0xff] }
  0x3c   :  { %297 = vmatpush.msrb.mxu0 %v182_v58  ;;  %278 = vmatpush.msra.mxu3 %v211_v0  ;;  %v345_v42 = vld [vmem:[#allocation10 + $0x90] sm:$0xff]  ;;  %v331_v43 = vld [vmem:[#allocation10 + $0x20] sm:$0xff]  ;;  %v344_v44 = vld [vmem:[#allocation10 + $0x88] sm:$0xff] }
  0x3d   :  { %317 = vmatpush.msrb.mxu1 %v214_v62  ;;  %259 = vmatpush.msra.mxu2 %v177_v63  ;;  %v330_v45 = vld [vmem:[#allocation10 + $0x18] sm:$0xff]  ;;  %v343_v46 = vld [vmem:[#allocation10 + $0x80] sm:$0xff]  ;;  %v329_v47 = vld [vmem:[#allocation10 + $0x10] sm:$0xff] }
  0x3e   :  { %298 = vmatpush.msrb.mxu0 %v180_v61  ;;  %279 = vmatpush.msra.mxu3 %v209_v4  ;;  %v328_v48 = vld [vmem:[#allocation10 + $0x8] sm:$0xff]  ;;  %v327_v49 = vld [vmem:[#allocation10] sm:$0xff]  ;;  %v239_v50 = vld [vmem:[#allocation9] sm:$0x3] }
  0x3f   :  { %318 = vmatpush.msrb.mxu1 %v212_v2  ;;  %260 = vmatpush.msra.mxu2 %v175_v3  ;;  %v242_v51 = vperm.slane %v239_v50, 1  ;;  %v241_v56 = vperm.slane %v239_v50, 0  ;;  %v424_v63 = vld [vmem:[%s657_s6] ss:$0 sm:$0xff] }
  0x40   :  { %299 = vmatpush.msrb.mxu0 %v178_v1  ;;  %280 = vmatpush.msra.mxu3 %v207_v7 }
  0x41   :  { %319 = vmatpush.msrb.mxu1 %v210_v6  ;;  %363 = vmatpush.msrb.mxu2 %v342_v11 }
  0x42   :  { %300 = vmatpush.msrb.mxu0 %v176_v5  ;;  %383 = vmatpush.msrb.mxu3 %v358_v9 }
  0x43   :  { %320 = vmatpush.msrb.mxu1 %v208_v8  ;;  %364 = vmatpush.msrb.mxu2 %v341_v12 }
  0x44   :  { %384 = vmatpush.msrb.mxu3 %v357_v10 }
  0x45   :  { %365 = vmatpush.msrb.mxu2 %v340_v14 }
  0x46   :  { %385 = vmatpush.msrb.mxu3 %v356_v13 }
  0x47   :  { %366 = vmatpush.msrb.mxu2 %v339_v16 }
  0x48   :  { %386 = vmatpush.msrb.mxu3 %v355_v15 }
  0x49   :  { %367 = vmatpush.msrb.mxu2 %v338_v18 }
  0x4a   :  { %387 = vmatpush.msrb.mxu3 %v354_v17 }
  0x4b   :  { %368 = vmatpush.msrb.mxu2 %v337_v20 }
  0x4c   :  { %388 = vmatpush.msrb.mxu3 %v353_v19 }
  0x4d   :  { %369 = vmatpush.msrb.mxu2 %v336_v22 }
  0x4e   :  { %389 = vmatpush.msrb.mxu3 %v352_v21 }
  0x4f   :  { %370 = vmatpush.msrb.mxu2 %v335_v24 }
  0x50   :  { %390 = vmatpush.msrb.mxu3 %v351_v23 }
  0x51   :  { %371 = vmatpush.msrb.mxu2 %v334_v26 }
  0x52   :  { %391 = vmatpush.msrb.mxu3 %v350_v25 }
  0x53   :  { %372 = vmatpush.msrb.mxu2 %v333_v39 }
  0x54   :  { %392 = vmatpush.msrb.mxu3 %v349_v27 }
  0x55   :  { %373 = vmatpush.msrb.mxu2 %v332_v41 }
  0x56   :  { %393 = vmatpush.msrb.mxu3 %v348_v28 }
  0x57   :  { %374 = vmatpush.msrb.mxu2 %v331_v43 }
  0x58   :  { %394 = vmatpush.msrb.mxu3 %v347_v30 }
  0x59   :  { %375 = vmatpush.msrb.mxu2 %v330_v45 }
  0x5a   :  { %395 = vmatpush.msrb.mxu3 %v346_v40 }
  0x5b   :  { %376 = vmatpush.msrb.mxu2 %v329_v47 }
  0x5c   :  { %396 = vmatpush.msrb.mxu3 %v345_v42 }
  0x5d   :  { %377 = vmatpush.msrb.mxu2 %v328_v48 }
  0x5e   :  { %397 = vmatpush.msrb.mxu3 %v344_v44 }
  0x5f   :  { %378 = vmatpush.msrb.mxu2 %v327_v49 }
  0x60   :  { %398 = vmatpush.msrb.mxu3 %v343_v46 }
  0xa0   :  { %v150_v33 = vpop.f32.mrf.mxu0 }
  0xa1   :  { %v170_v34 = vpop.f32.mrf.mxu1  ;;  %v151_v35 = vadd.f32 %v150_v33, %v125_v31 }
  0xa2   :  { %v171_v36 = vadd.f32 %v170_v34, %v126_v32 }
  0xa3   :  { %v173_v37 = vmax.f32 %v151_v35, 0.0 }
  0xa4   :  { %v174_v38 = vmax.f32 %v171_v36, 0.0 }
  0xa5   :  { %261 = vmatmul.f32.vlgmr.msra.gmra.mxu2 %v173_v37  ;;  %301 = vmatmul.f32.vlgmr.msrb.gmra.mxu0 %v173_v37 }
  0xa6   :  { %281 = vmatmul.f32.vlgmr.msra.gmra.mxu3 %v174_v38  ;;  %321 = vmatmul.f32.vlgmr.msrb.gmra.mxu1 %v174_v38 }
 0x122   :  { %v302_v52 = vpop.f32.mrf.mxu0 }
 0x123   :  { %v303_v53 = vadd.f32 %v302_v52, %v242_v51  ;;  %v322_v54 = vpop.f32.mrf.mxu1 }
 0x125   :  { %v323_v55 = vadd.f32 %v322_v54, %v303_v53 }
 0x127   :  { %v326_v57 = vmax.f32 %v323_v55, 0.0 }
 0x128   :  { %v262_v58 = vpop.f32.mrf.mxu2 }
 0x129   :  { %v263_v59 = vadd.f32 %v262_v58, %v241_v56  ;;  %399 = vmatmul.f32.vlgmr.msrb.gmra.mxu3 %v326_v57  ;;  %v282_v60 = vpop.f32.mrf.mxu3 }
 0x12b   :  { %v283_v61 = vadd.f32 %v282_v60, %v263_v59 }
 0x12d   :  { %v325_v62 = vmax.f32 %v283_v61, 0.0 }
 0x12f   :  { %379 = vmatmul.f32.vlgmr.msrb.gmra.mxu2 %v325_v62 }
 0x1ac   :  { %v400_v2 = vpop.f32.mrf.mxu3 }
 0x1b2   :  { %v380_v0 = vpop.f32.mrf.mxu2 }
 0x1b3   :  { %v381_v1 = vadd.f32 %v424_v63, %v380_v0 }
 0x1b5   :  { %v401_v3 = vadd.f32 %v400_v2, %v381_v1 }
 0x1b7   :  { %403 = vst [vmem:[%s658_s7] sm:$0xff] %v401_v3 }
 0x1b8   :  { %408 = vsyncpa [#allocation3], 1 }
 0x1b9   :  { %409 = vsyncpa [#allocation5], 1 }
 0x1ba   :  { %410 = vsyncpa [#allocation8], 1 }
 0x1bb   :  { %411 = vsyncpa [#allocation11], 1 }

</bundles_post_ra>
